<compile_context>
chip_gen: v7x
topology: tpu7x:2x2x1
jax: 0.10.0
libtpu: 0.0.40
codegen_flags: <defaults>
</compile_context>

<pallas_src>
import math
import functools

import jax
import jax.numpy as jnp
from jax.experimental import pallas as pl
from jax.experimental.pallas import tpu as pltpu


def _round_up(x, m):
    return ((x + m - 1) // m) * m


def _vmem_footprint_bytes(tb, tc, d):
    # Double-buffered: bf16 weight tile + f32 out tile + bf16 feats tile + i32 labels.
    return 2 * (2 * d * tc + 4 * tb * tc + 2 * tb * d + 4 * tb)


def _choose_tiles(B, C, D, block_b, block_c, vmem_budget_bytes):
    b_req = 512 if block_b is None else int(block_b)
    tb = min(_round_up(max(b_req, 16), 16), _round_up(B, 16))

    c_req = 8192 if block_c is None else int(block_c)
    c_req = _round_up(max(c_req, 128), 128)
    c_full = _round_up(C, 128)

    def tc_cap_for(tb_):
        num = vmem_budget_bytes // 2 - 2 * tb_ * D - 4 * tb_
        den = 2 * D + 4 * tb_
        return (num // den // 128) * 128 if num > 0 else 0

    cap = tc_cap_for(tb)
    while cap < 128 and tb > 16:
        tb = max(_round_up(tb // 2, 16), 16)
        cap = tc_cap_for(tb)
    tc = min(c_req, c_full, cap) if cap >= 128 else 128
    return tb, tc


def _arcface_kernel(feats_ref, weight_ref, labels_ref, out_ref, *,
                    cos_margin, sin_margin, min_cos_theta, margin_am,
                    scale, inv_scale, tile_c):
    """One (TB, TC) output tile of the ArcFace logits.

    feats_ref  : (TB, D)  bf16 VMEM  -- row-normalized features
    weight_ref : (D, TC)  bf16 VMEM  -- column-normalized weight, pre-scaled by `scale`
    labels_ref : (TB, 1)  i32  VMEM
    out_ref    : (TB, TC) f32  VMEM
    """
    # MXU matmul in bf16, f32 accumulation.  Weight already carries 1/||w|| and
    # scale, so this is scale * cos(theta); clip at +/-scale == clip(cos,-1,1)*scale.
    cos_s = jnp.dot(feats_ref[...], weight_ref[...],
                    preferred_element_type=jnp.float32)
    cos_s = jnp.clip(cos_s, -scale, scale)

    tb, tc = out_ref.shape
    col0 = pl.program_id(0) * tile_c          # grid axis 0 = C tiles
    class_ids = col0 + jax.lax.broadcasted_iota(jnp.int32, (tb, tc), 1)
    onehot = class_ids == labels_ref[...]     # (TB, 1) broadcasts over TC

    # Margin math only on the label column: (TB, 1) EUP/VPU work instead of (TB, TC).
    # Rows whose label falls outside this C tile get lab_cos = 0; the (unused)
    # margin value is never selected by the final where.
    lab_cos = jnp.sum(jnp.where(onehot, cos_s, 0.0), axis=-1, keepdims=True) * inv_scale
    sin = jnp.sqrt(jnp.maximum(1.0 - lab_cos * lab_cos, 0.0))
    lab_cos_m = lab_cos * cos_margin - sin * sin_margin
    lab_cos_m = jnp.where(lab_cos > min_cos_theta, lab_cos_m, lab_cos - margin_am)

    out_ref[...] = jnp.where(onehot, lab_cos_m * scale, cos_s)


def arcface_forward(feats, weight, labels, *,
                    margin_arc=0.35, margin_am=0.0, scale=32.0,
                    block_b=None, block_c=None,
                    vmem_budget_bytes=40 * 1024 * 1024):
    """ArcFace logits.  feats: (B, D) f32, weight: (D, C) f32, labels: (B,) int."""
    B, D = feats.shape
    Dw, C = weight.shape
    assert D == Dw
    assert scale > 0.0
    eps = 1e-12  # F.normalize default eps

    # ---- hoisted normalization; scale folded into the bf16 weight cast -----
    f_norm = jnp.sqrt(jnp.sum(feats * feats, axis=1, keepdims=True))
    feats_n = (feats / jnp.maximum(f_norm, eps)).astype(jnp.bfloat16)

    w_colnorm = jnp.sqrt(jnp.sum(weight * weight, axis=0, keepdims=True))   # (1, C)
    weight_n = (weight * (scale / jnp.maximum(w_colnorm, eps))).astype(jnp.bfloat16)

    labels2d = labels.reshape(B, 1).astype(jnp.int32)

    # ---- tile sizes (lane/sublane aligned, VMEM-budgeted) -------------------
    tb, tc = _choose_tiles(B, C, D, block_b, block_c, vmem_budget_bytes)
    Bp = _round_up(B, tb)
    Cp = _round_up(C, tc)

    if Bp != B:
        # Padded rows are all-zero feats (cos = 0 everywhere -> no NaNs) and are
        # sliced off below; their label 0 is irrelevant.
        feats_n = jnp.pad(feats_n, ((0, Bp - B), (0, 0)))
        labels2d = jnp.pad(labels2d, ((0, Bp - B), (0, 0)))
    if Cp != C:
        # Normalized-then-padded: padded columns are exact zeros, and their
        # class ids are >= C so they can never be selected as a label column.
        weight_n = jnp.pad(weight_n, ((0, 0), (0, Cp - C)))

    kernel = functools.partial(
        _arcface_kernel,
        cos_margin=math.cos(margin_arc),
        sin_margin=math.sin(margin_arc),
        min_cos_theta=math.cos(math.pi - margin_arc),
        margin_am=float(margin_am),
        scale=float(scale),
        inv_scale=float(1.0 / scale),
        tile_c=tc,
    )

    vmem_limit = max(48 * 1024 * 1024,
                     _vmem_footprint_bytes(tb, tc, D) + 4 * 1024 * 1024)

    out = pl.pallas_call(
        kernel,
        out_shape=jax.ShapeDtypeStruct((Bp, Cp), jnp.float32),
        grid_spec=pltpu.PrefetchScalarGridSpec(
            num_scalar_prefetch=0,
            # C tiles outer, B tiles inner: the weight tile's block index only
            # depends on the outer axis, so each weight column block is DMA'd
            # from HBM exactly once; small feats/labels tiles are the revisited
            # ones (and with a single batch tile they are fetched only once).
            grid=(Cp // tc, Bp // tb),
            in_specs=[
                pl.BlockSpec((tb, D), lambda j, i: (i, 0)),   # feats (resident/small)
                pl.BlockSpec((D, tc), lambda j, i: (0, j)),   # weight: single pass
                pl.BlockSpec((tb, 1), lambda j, i: (i, 0)),   # labels
            ],
            out_specs=pl.BlockSpec((tb, tc), lambda j, i: (i, j)),
        ),
        compiler_params=pltpu.CompilerParams(
            dimension_semantics=("parallel", "parallel"),
            vmem_limit_bytes=int(vmem_limit),
        ),
    )(feats_n, weight_n, labels2d)

    if Bp != B or Cp != C:
        out = out[:B, :C]
    return out


def init_arcface_weight(key, feat_dim, num_class):
    """Deterministic equivalent of:
       torch.Tensor(feat_dim, num_class).uniform_(-1,1).renorm_(2,1,1e-5).mul_(1e5)"""
    w = jax.random.uniform(key, (feat_dim, num_class),
                           minval=-1.0, maxval=1.0, dtype=jnp.float32)
    col_norm = jnp.sqrt(jnp.sum(w * w, axis=0, keepdims=True))
    maxnorm = 1e-5
    factor = jnp.where(col_norm > maxnorm, maxnorm / (col_norm + 1e-7), 1.0)
    return w * factor * 1e5


if __name__ == "__main__":
    B, D, C = 32, 256, 512          # batch, feat_dim, num_class (small demo shapes)
    MARGIN_ARC, MARGIN_AM, SCALE = 0.35, 0.0, 32.0

    key = jax.random.PRNGKey(0)
    k_w, k_f, k_l = jax.random.split(key, 3)

    weight = init_arcface_weight(k_w, D, C)
    feats = jax.random.normal(k_f, (B, D), dtype=jnp.float32)
    labels = jax.random.randint(k_l, (B,), 0, C, dtype=jnp.int32)

    # Small blocks to exercise the (C, B) tiled grid at demo shapes -> grid=(2, 2).
    out = arcface_forward(feats, weight, labels,
                          margin_arc=MARGIN_ARC, margin_am=MARGIN_AM, scale=SCALE,
                          block_b=16, block_c=256)
    jax.block_until_ready(out)

    # ---- reference 1: same bf16/scale-folded matmul path as the kernel ------
    eps = 1e-12
    fn = feats / jnp.maximum(
        jnp.sqrt(jnp.sum(feats * feats, axis=1, keepdims=True)), eps)
    inv_wn = 1.0 / jnp.maximum(
        jnp.sqrt(jnp.sum(weight * weight, axis=0, keepdims=True)), eps)
    w_scaled_bf = (weight * (SCALE * inv_wn)).astype(jnp.bfloat16)
    cos_s_ref = jnp.dot(fn.astype(jnp.bfloat16), w_scaled_bf,
                        preferred_element_type=jnp.float32)
    cos_s_ref = jnp.clip(cos_s_ref, -SCALE, SCALE)
    cos_bf = cos_s_ref / SCALE
    sin_bf = jnp.sqrt(jnp.maximum(1.0 - cos_bf * cos_bf, 0.0))
    cm_bf = cos_bf * math.cos(MARGIN_ARC) - sin_bf * math.sin(MARGIN_ARC)
    cm_bf = jnp.where(cos_bf > math.cos(math.pi - MARGIN_ARC), cm_bf, cos_bf - MARGIN_AM)
    onehot = jax.nn.one_hot(labels, C, dtype=bool)
    ref_bf = jnp.where(onehot, cm_bf * SCALE, cos_s_ref)
    assert jnp.allclose(out, ref_bf, atol=5e-3, rtol=1e-5), "mismatch vs bf16-path reference"

    # ---- reference 2: pure f32 PyTorch-equivalent math (loose, bf16 quantization) ----
    cos = jnp.clip(fn @ (weight * inv_wn), -1.0, 1.0)
    sin = jnp.sqrt(1.0 - cos * cos)
    cm = cos * math.cos(MARGIN_ARC) - sin * math.sin(MARGIN_ARC)
    cm = jnp.where(cos > math.cos(math.pi - MARGIN_ARC), cm, cos - MARGIN_AM)
    ref_f32 = jnp.where(onehot, cm, cos) * SCALE
    assert jnp.allclose(out, ref_f32, atol=0.2), "mismatch vs f32 reference"

    print("KERNEL_OK")
</pallas_src>

<mosaic_0001>
module attributes {stable_mosaic.version = 11 : i64} {
  func.func @_arcface_kernel(%arg0: i32, %arg1: i32, %arg2: memref<16x256xbf16, #tpu.memory_space<vmem>>, %arg3: memref<256x256xbf16, #tpu.memory_space<vmem>>, %arg4: memref<16x1xi32, #tpu.memory_space<vmem>>, %arg5: memref<16x256xf32, #tpu.memory_space<vmem>>) attributes {dimension_semantics = [#tpu.dimension_semantics<parallel>, #tpu.dimension_semantics<parallel>], iteration_bounds = array<i64: 2, 2>, scalar_prefetch = 0 : i64, scratch_operands = 0 : i64, tpu.core_type = #tpu.core_type<tc>, window_params = [{transform_indices = @transform_0, window_bounds = array<i64: 16, 256>}, {transform_indices = @transform_1, window_bounds = array<i64: 256, 256>}, {transform_indices = @transform_2, window_bounds = array<i64: 16, 1>}, {transform_indices = @transform_3, window_bounds = array<i64: 16, 256>}]} {
    %c0 = arith.constant 0 : index
    %c0_0 = arith.constant 0 : index
    %0 = vector.load %arg2[%c0, %c0_0] : memref<16x256xbf16, #tpu.memory_space<vmem>>, vector<16x256xbf16>
    %c0_1 = arith.constant 0 : index
    %c0_2 = arith.constant 0 : index
    %1 = vector.load %arg3[%c0_1, %c0_2] : memref<256x256xbf16, #tpu.memory_space<vmem>>, vector<256x256xbf16>
    %cst = arith.constant dense<0.000000e+00> : vector<16x256xf32>
    %2 = tpu.matmul %0, %1, %cst {dimension_numbers = #tpu.dot_dimension_numbers<[1], [0], [0], [1], [0, 0, 1, 1], [], []>} : vector<16x256xbf16>, vector<256x256xbf16>, vector<16x256xf32> -> vector<16x256xf32>
    %cst_3 = arith.constant -3.200000e+01 : f32
    %cst_4 = arith.constant 3.200000e+01 : f32
    %3 = vector.broadcast %cst_3 : f32 to vector<16x256xf32>
    %4 = arith.maximumf %3, %2 : vector<16x256xf32>
    %5 = vector.broadcast %cst_4 : f32 to vector<16x256xf32>
    %6 = arith.minimumf %5, %4 : vector<16x256xf32>
    %c256_i32 = arith.constant 256 : i32
    %7 = arith.muli %arg0, %c256_i32 : i32
    %8 = tpu.iota {dimensions = array<i32: 1>} : vector<16x256xi32>
    %9 = vector.broadcast %7 : i32 to vector<16x256xi32>
    %10 = arith.addi %9, %8 : vector<16x256xi32>
    %c0_5 = arith.constant 0 : index
    %c0_6 = arith.constant 0 : index
    %11 = vector.load %arg4[%c0_5, %c0_6] : memref<16x1xi32, #tpu.memory_space<vmem>>, vector<16x1xi32>
    %12 = vector.broadcast %11 : vector<16x1xi32> to vector<16x256xi32>
    %13 = arith.cmpi eq, %10, %12 : vector<16x256xi32>
    %cst_7 = arith.constant 0.000000e+00 : f32
    %14 = vector.broadcast %cst_7 : f32 to vector<16x256xf32>
    %15 = arith.select %13, %6, %14 : vector<16x256xi1>, vector<16x256xf32>
    %cst_8 = arith.constant dense<0.000000e+00> : vector<16xf32>
    %16 = vector.multi_reduction <add>, %15, %cst_8 [1] : vector<16x256xf32> to vector<16xf32>
    %17 = vector.shape_cast %16 : vector<16xf32> to vector<16x1xf32>
    %cst_9 = arith.constant 3.125000e-02 : f32
    %18 = vector.broadcast %cst_9 : f32 to vector<16x1xf32>
    %19 = arith.mulf %17, %18 : vector<16x1xf32>
    %20 = arith.mulf %19, %19 : vector<16x1xf32>
    %cst_10 = arith.constant 1.000000e+00 : f32
    %21 = vector.broadcast %cst_10 : f32 to vector<16x1xf32>
    %22 = arith.subf %21, %20 : vector<16x1xf32>
    %cst_11 = arith.constant 0.000000e+00 : f32
    %23 = vector.broadcast %cst_11 : f32 to vector<16x1xf32>
    %24 = arith.maximumf %22, %23 : vector<16x1xf32>
    %25 = math.sqrt %24 : vector<16x1xf32>
    %cst_12 = arith.constant 0.939372718 : f32
    %26 = vector.broadcast %cst_12 : f32 to vector<16x1xf32>
    %27 = arith.mulf %19, %26 : vector<16x1xf32>
    %cst_13 = arith.constant 0.342897803 : f32
    %28 = vector.broadcast %cst_13 : f32 to vector<16x1xf32>
    %29 = arith.mulf %25, %28 : vector<16x1xf32>
    %30 = arith.subf %27, %29 : vector<16x1xf32>
    %cst_14 = arith.constant -0.939372718 : f32
    %31 = vector.broadcast %cst_14 : f32 to vector<16x1xf32>
    %32 = arith.cmpf ogt, %19, %31 : vector<16x1xf32>
    %cst_15 = arith.constant 0.000000e+00 : f32
    %33 = vector.broadcast %cst_15 : f32 to vector<16x1xf32>
    %34 = arith.subf %19, %33 : vector<16x1xf32>
    %35 = arith.select %32, %30, %34 : vector<16x1xi1>, vector<16x1xf32>
    %cst_16 = arith.constant 3.200000e+01 : f32
    %36 = vector.broadcast %cst_16 : f32 to vector<16x1xf32>
    %37 = arith.mulf %35, %36 : vector<16x1xf32>
    %38 = vector.shape_cast %37 : vector<16x1xf32> to vector<16x1xf32>
    %39 = vector.broadcast %38 : vector<16x1xf32> to vector<16x256xf32>
    %40 = arith.select %13, %39, %6 : vector<16x256xi1>, vector<16x256xf32>
    %c0_17 = arith.constant 0 : index
    %c0_18 = arith.constant 0 : index
    %41 = vector.load %arg5[%c0_17, %c0_18] : memref<16x256xf32, #tpu.memory_space<vmem>>, vector<16x256xf32>
    tpu.vector_store %arg5[%c0_17, %c0_18], %40 {strides = array<i32>} : memref<16x256xf32, #tpu.memory_space<vmem>>, vector<16x256xf32>,
    return
  }
  func.func @transform_0(%arg0: i32, %arg1: i32) -> (i32, i32) {
    %c0_i32 = arith.constant 0 : i32
    %c0_i32_0 = arith.constant 0 : i32
    return %arg1, %c0_i32 : i32, i32
  }
  func.func @transform_1(%arg0: i32, %arg1: i32) -> (i32, i32) {
    %c0_i32 = arith.constant 0 : i32
    %c0_i32_0 = arith.constant 0 : i32
    return %c0_i32, %arg0 : i32, i32
  }
  func.func @transform_2(%arg0: i32, %arg1: i32) -> (i32, i32) {
    %c0_i32 = arith.constant 0 : i32
    %c0_i32_0 = arith.constant 0 : i32
    return %arg1, %c0_i32 : i32, i32
  }
  func.func @transform_3(%arg0: i32, %arg1: i32) -> (i32, i32) {
    %c0_i32 = arith.constant 0 : i32
    return %arg1, %arg0 : i32, i32
  }
}

</mosaic_0001>

<bundles_post_ra>
// kernel: tpu_custom_call.1
= control target key start
LH: loop header
LB: loop body
LE: loop exit
PB: predicated region body
PF: predicated region fallthrough
CT: control target
= control target key end

     0   :  { %8 = vsyncpa [#allocation3], 0  ;;  %s1446_s0 = inlined_call_operand.vmem [shape: bf16[32,256], index: 0, kind: input, shape index: {}]   ;;  %s1447_s1 = inlined_call_operand.hbm [shape: bf16[256,512], index: 1, kind: input, shape index: {}]   ;;  %s1448_s2 = inlined_call_operand.vmem [shape: s32[32,1], index: 2, kind: input, shape index: {}]   ;;  %s1449_s3 = inlined_call_operand.hbm [shape: f32[32,512], index: 3, kind: output, shape index: {}]  }
   0x1   :  { %10 = vsyncpa [#allocation3 + $0x1], 0 }
   0x2   :  { %11 = vsyncpa [#allocation4], 0 }
   0x3   :  { %13 = vsyncpa [#allocation4 + $0x1], 0  ;;  %s1119_s12 = smov 0   ;;  %s1121_s13 = smov 0  }
   0x4   :  { %s1123_s14 = smov 0   ;;  %s1125_s15 = smov 0  }
   0x5   :  { %s1127_s16 = smov 0   ;;  %s1129_s17 = smov 0  }
   0x6   :  { %s1131_s18 = smov 0   ;;  %s1133_s19 = smov 0  }
   0x7   :  { %s1135_s20 = smov 0   ;;  %s1137_s21 = smov 0  }
   0x8   :  { %s1139_s22 = smov 0  }
   0x9 LB: > { %s707_s23 = sadd.s32 4294967295, %s1088_s22   ;;  %s708_s24 = sadd.s32 4294967294, %s1088_s22   ;;  %s1088_s22 = sphi %s1139_s22, %s19_s22   ;;  %s1084_s21 = sphi %s1137_s21, %s1470_s21   ;;  %s1080_s20 = sphi %s1135_s20, %s1469_s20   ;;  %s1076_s19 = sphi %s1133_s19, %s1468_s19   ;;  %s1072_s18 = sphi %s1131_s18, %s1467_s18   ;;  %s1068_s17 = sphi %s1129_s17, %s1466_s17   ;;  %s1064_s16 = sphi %s1127_s16, %s1465_s16   ;;  %s1060_s15 = sphi %s1125_s15, %s1464_s15   ;;  %s1056_s14 = sphi %s1123_s14, %s1463_s14   ;;  %s1052_s13 = sphi %s1121_s13, %s1462_s13   ;;  %s1048_s12 = sphi %s1119_s12, %s1461_s12  }
   0xa   : > { %s28_s25 = sadd.s32 1, %s1080_s20  ;;  %s31_s26 = sadd.s32 1, %s1084_s21 }
   0xb   : > { %p29_p0 = scmp.ge.s32.totalorder %s28_s25, 2  ;;  %s64_s27 = sadd.s32 1, %s1068_s17 }
   0xc   : > { %p71_p1 = scmp.ne.s32.totalorder %s1068_s17, %s1064_s16  ;;  %p72_p2 = scmp.eq.s32.totalorder %s1088_s22, 0 }
   0xd   : > { %s1472_s25 = smov (%p29_p0, %s28_s25), 0  ;;  %s1474_s26 = smov (!%p29_p0, %s31_s26), %s1084_s21 }
   0xe   : > { %p1183_p3 = por %p72_p2, %p71_p1  ;;  %p77_p4 = scmp.ne.s32.totalorder %s1064_s16, %s1060_s15 }
   0xf   : > { %p33_p5 = scmp.ge.s32.totalorder %s1474_s26, 2  ;;  %p78_p6 = scmp.eq.s32.totalorder %s707_s23, 0 }
  0x10   : > { %s113_s29 = ssub.s32 %s1080_s20, %s1472_s25  ;;  %s118_s30 = sadd.s32 1, %s1056_s14 }
  0x11   : > { %s1476_s26 = smov (%p33_p5, %s1474_s26), 0  ;;  %p1193_p7 = por %p78_p6, %p77_p4 }
  0x12   : > { %1453 = sst [smem:[#allocation8_spill]] %s1476_s26  ;;  %p128_p8 = scmp.ne.s32.totalorder %s1056_s14, %s1052_s13 }
  0x13   : > { %s61_s5 = ssub.s32 %s1084_s21, %s1476_s26  ;;  %p129_p9 = scmp.eq.s32.totalorder %s707_s23, 3 }
  0x14   : > { %p62_p10 = scmp.eq.s32.totalorder %s61_s5, 0  ;;  %s115_s6 = sor.u32 %s113_s29, %s61_s5 }
  0x15   : > { %p116_p11 = scmp.eq.s32.totalorder %s115_s6, 0  ;;  %p1201_p12 = por %p129_p9, %p128_p8 }
  0x16   : > { %s1206_s8 = scalar_select %p62_p10, %s1068_s17, %s64_s27  }
  0x17   : > { %s1455_s7 = scalar_select %p1201_p12, 1, 0 }
  0x18   : > { %s1209_s9 = scalar_select %p116_p11, %s1056_s14, %s118_s30  }
  0x19   : > { %p134_p13 = scmp.ne.s32.totalorder %s1052_s13, %s1048_s12  ;;  %p135_p0 = scmp.eq.s32.totalorder %s708_s24, 3 }
  0x1a   : > { %p783_p1 = scmp.lt.s32.totalorder %s1088_s22, 4  ;;  %s165_s11 = sand.u32 1, %s1068_s17  }
  0x1b   : > { %p1214_p2 = por %p135_p0, %p134_p13  ;;  %s711_s15 = sshll.u32 %s165_s11, 8 }
  0x1c   : > { %s768_s23 = sshll.u32 %s1084_s21, 7  ;;  %s169_s27 = scalar_lea.vmem [#allocation2], %s711_s15 }
  0x1d   : > { %s1456_s10 = scalar_select %p1214_p2, 1, 0 }
  0x1e   : > { %s1223_s6 = scalar_lea.hbm %s1447_s1, %s768_s23  ;;  %s176_s30 = sshll.u32 %s169_s27, 4  ;;  %s1225_s30 = int_to_ptr.vmem [resolvable:$true] %s176_s30 }
  0x1f   : > { %p1229_p4 = pnand %p783_p1, %p1183_p3  ;;  %s1233_s26 = scalar_lea.sflag [#allocation3], %s165_s11 }
  0x20   : > { %s936_s29 = scalar_lea.hbm %s1223_s6, 4096  ;;  %s941_s28 = scalar_lea.hbm %s1447_s1, 8192 }
  0x21   : > { %p937_p5 = scmp.ne.s32.totalorder %s1223_s6, %s936_s29  ;;  %p938_p6 = pneg %p1229_p4 }
  0x22   : > { %p942_p3 = scmp.lt.u32.totalorder %s1223_s6, %s1447_s1  ;;  %p943_p10 = scmp.lt.u32.totalorder %s941_s28, %s936_s29 }
  0x23   : > { %p939_p8 = pnand %p938_p6, %p937_p5  ;;  %p945_p13 = scmp.lt.u32.totalorder %s936_s29, %s1223_s6 }
  0x24   : > { %p944_p11 = por %p943_p10, %p942_p3 }
  0x25   : > { %p940_p9 = pneg %p939_p8 }
  0x26   : > { %p946_p0 = por %p945_p13, %p944_p11 }
  0x28   : > { %p947_p1 = pnand %p946_p0, %p940_p9 }
  0x2a   : > { %950 = shalt.err (!%p947_p1)
}
  0x2b   : > { %s951_s11 = scalar_lea.vmem %s1225_s30, 4096  ;;  %s1090_s15 = smov [#allocation2]  }
  0x2c   : > { %p952_p5 = scmp.ne.s32.totalorder %s1225_s30, %s951_s11  ;;  %s956_s23 = sshll.u32 %s1090_s15, 4  ;;  %s957_s23 = int_to_ptr.vmem [resolvable:$false] %s956_s23 }
  0x2d   : > { %s958_s5 = scalar_lea.vmem %s957_s23, 8192  ;;  %p959_p12 = scmp.lt.s32.totalorder %s1225_s30, %s957_s23 }
  0x2e   : > { %p954_p8 = pnand %p952_p5, %p938_p6  ;;  %p960_p3 = scmp.lt.s32.totalorder %s958_s5, %s951_s11 }
  0x30   : > { %p955_p2 = pneg %p954_p8  ;;  %p961_p10 = por %p960_p3, %p959_p12 }
  0x32   : > { %p962_p11 = pnand %p961_p10, %p955_p2 }
  0x34   : > { %965 = shalt.err (!%p962_p11)
}
  0x35   : > { %s1091_s29 = smov 256   ;;  %s1092_s28 = smov 128  }
  0x36   : > { %s1093_s27 = smov 8   ;;  %p714_p6 = scmp.ge.s32.totalorder %s1088_s22, 1 }
  0x37   : > { %778 = dma.hbm_to_vmem [thread:$0]  (!%p1229_p4), %s1223_s6, 4096, %s1225_s30, %s1233_s26, %s1091_s29, %s1092_s28, %s1093_s27  }
  0x38   : > { %p193_p9 = scmp.lt.s32.totalorder %s1088_s22, 5 }
  0x3a   : > { %p194_p13 = pnand %p714_p6, %p193_p9 }
  0x3b   : > { %s199_s11 = sand.u32 (!%p194_p13), 1, %s1064_s16  }
  0x3c   : > { %197 = sbr.rel (%p194_p13) target bundleno = 544 (0x220), region = 32  ;;  %s715_s15 = sshll.u32 (!%p194_p13), %s199_s11, 8 }
  0x3d   : > { %s200_s23 = scalar_lea.sflag (!%p194_p13), [#allocation3], %s199_s11  ;;  %s1264_s5 = scalar_lea.vmem (!%p194_p13), [#allocation2], %s715_s15 }
  0x43   : > { %1039 = dma.done.wait (%p1193_p7), %s200_s23, 4096  }
  0x44   : > { %1041 = vsyncadd (%p1193_p7), %s200_s23, 4294963200  ;;  %v1094_v0 = vmov 0   ;;  %v881_v1 = vld [vmem:[%s1264_s5 + $0x4] ss:$8 sps:$4 sm:$0xff]   ;;  %v883_v2 = vld [vmem:[%s1264_s5] ss:$8 sps:$4 sm:$0xff]   ;;  %v509_v37 = vlaneseq }
  0x45   : > { %880 = vset.pattern.permute.xlu0 %v1094_v0  ;;  %457 = vmatprep.subr.bf16.mxu0 %v881_v1  ;;  %v884_v3 = vld [vmem:[%s1264_s5 + $0x14] ss:$8 sps:$4 sm:$0xff]   ;;  %v886_v4 = vld [vmem:[%s1264_s5 + $0x10] ss:$8 sps:$4 sm:$0xff]   ;;  %v887_v5 = vld [vmem:[%s1264_s5 + $0x24] ss:$8 sps:$4 sm:$0xff]  }
  0x46   : > { %458 = vmatpush1.bf16.msra.mxu0 %v883_v2  ;;  %s717_s26 = sshll.u32 %s1072_s18, 1  ;;  %v889_v6 = vld [vmem:[%s1264_s5 + $0x20] ss:$8 sps:$4 sm:$0xff]   ;;  %v890_v7 = vld [vmem:[%s1264_s5 + $0x34] ss:$8 sps:$4 sm:$0xff]   ;;  %v510_v38 = vand.u32 127, %v509_v37 }
  0x47   : > { %459 = vmatprep.subr.bf16.mxu0 %v884_v3  ;;  %p238_p7 = scmp.lt.s32.totalorder %s717_s26, 3  ;;  %v892_v8 = vld [vmem:[%s1264_s5 + $0x30] ss:$8 sps:$4 sm:$0xff]   ;;  %v893_v9 = vld [vmem:[%s1264_s5 + $0x44] ss:$8 sps:$4 sm:$0xff]   ;;  %s760_s11 = sshll.u32 %s1076_s19, 8 }
  0x48   : > { %v895_v10 = vld [vmem:[%s1264_s5 + $0x40] ss:$8 sps:$4 sm:$0xff]   ;;  %v896_v11 = vld [vmem:[%s1264_s5 + $0x54] ss:$8 sps:$4 sm:$0xff]   ;;  %v898_v12 = vld [vmem:[%s1264_s5 + $0x50] ss:$8 sps:$4 sm:$0xff]   ;;  %v512_v40 = vstv %s760_s11 }
  0x49   : > { %s1478_s26 = smov (!%p238_p7, %s717_s26), 3  ;;  %v899_v13 = vld [vmem:[%s1264_s5 + $0x64] ss:$8 sps:$4 sm:$0xff]   ;;  %v901_v16 = vld [vmem:[%s1264_s5 + $0x60] ss:$8 sps:$4 sm:$0xff]   ;;  %v511_v39 = vadd.s32 128, %v510_v38  ;;  %v1316_v42 = vadd.s32 %v512_v40, %v510_v38 }
  0x4a   : > { %460 = vmatpush1.bf16.msra.mxu0 %v886_v4  ;;  %s769_s4 = sshll.u32 %s1478_s26, 3  ;;  %v902_v17 = vld [vmem:[%s1264_s5 + $0x74] ss:$8 sps:$4 sm:$0xff]   ;;  %v904_v19 = vld [vmem:[%s1264_s5 + $0x70] ss:$8 sps:$4 sm:$0xff]   ;;  %s234_s15 = sand.u32 1, %s1052_s13  }
  0x4b   : > { %461 = vmatprep.subr.bf16.mxu0 %v887_v5  ;;  %s1286_s24 = scalar_lea.vmem %s1446_s0, %s769_s4  ;;  %s249_s27 = scalar_lea.vmem %s1448_s2, %s769_s4  ;;  %v905_v20 = vld [vmem:[%s1264_s5 + $0x84] ss:$8 sps:$4 sm:$0xff]   ;;  %v907_v21 = vld [vmem:[%s1264_s5 + $0x80] ss:$8 sps:$4 sm:$0xff]   ;;  %v908_v22 = vld [vmem:[%s1264_s5 + $0x94] ss:$8 sps:$4 sm:$0xff]   ;;  %v1318_v43 = vadd.s32 %v512_v40, %v511_v39 }
  0x4c   : > { %v931_v14 = vld [vmem:[%s1286_s24 + $0x4] ss:$8 sps:$4 sm:$0xff]   ;;  %v910_v23 = vld [vmem:[%s1264_s5 + $0x90] ss:$8 sps:$4 sm:$0xff]   ;;  %v913_v25 = vld [vmem:[%s1264_s5 + $0xa0] ss:$8 sps:$4 sm:$0xff]  }
  0x4d   : > { %v515_v15 = vld [vmem:[%s249_s27] sm:$0xff]  ;;  %489 = vmatprep.mubr.bf16.mxu0 %v931_v14  ;;  %v516_v18 = vld [vmem:[%s249_s27 + $0x8] sm:$0xff]  ;;  %v914_v26 = vld [vmem:[%s1264_s5 + $0xb4] ss:$8 sps:$4 sm:$0xff]   ;;  %s763_s23 = sshll.u32 %s1076_s19, 1  ;;  %s716_s26 = sshll.u32 %s234_s15, 5 }
  0x4e   : > { %462 = vmatpush1.bf16.msra.mxu0 %v889_v6  ;;  %518 = vperm.xlu0 %880, %v515_v15   ;;  %v911_v24 = vld [vmem:[%s1264_s5 + $0xa4] ss:$8 sps:$4 sm:$0xff]   ;;  %v916_v27 = vld [vmem:[%s1264_s5 + $0xb0] ss:$8 sps:$4 sm:$0xff]   ;;  %v919_v29 = vld [vmem:[%s1264_s5 + $0xc0] ss:$8 sps:$4 sm:$0xff]  }
  0x4f   : > { %463 = vmatprep.subr.bf16.mxu0 %v890_v7  ;;  %v917_v28 = vld [vmem:[%s1264_s5 + $0xc4] ss:$8 sps:$4 sm:$0xff]   ;;  %v920_v30 = vld [vmem:[%s1264_s5 + $0xd4] ss:$8 sps:$4 sm:$0xff]   ;;  %v922_v31 = vld [vmem:[%s1264_s5 + $0xd0] ss:$8 sps:$4 sm:$0xff]  }
  0x50   : > { %v923_v32 = vld [vmem:[%s1264_s5 + $0xe4] ss:$8 sps:$4 sm:$0xff]   ;;  %v925_v33 = vld [vmem:[%s1264_s5 + $0xe0] ss:$8 sps:$4 sm:$0xff]   ;;  %v926_v34 = vld [vmem:[%s1264_s5 + $0xf4] ss:$8 sps:$4 sm:$0xff]  }
  0x51   : > { %v928_v35 = vld [vmem:[%s1264_s5 + $0xf0] ss:$8 sps:$4 sm:$0xff]   ;;  %v929_v36 = vld [vmem:[%s1286_s24] ss:$8 sps:$4 sm:$0xff]   ;;  %s770_s5 = sshll.u32 %s1072_s18, 3  ;;  %s236_s6 = scalar_lea.vmem [#allocation5], %s716_s26 }
  0x52   : > { %464 = vmatpush1.bf16.msra.mxu0 %v892_v8  ;;  %521 = vperm.xlu0 %880, %v516_v18   ;;  %s593_s4 = sadd.s32 %s770_s5, %s763_s23  ;;  %s596_s30 = sshll.u32 %s236_s6, 4  ;;  %s1366_s30 = int_to_ptr.vmem [resolvable:$true] %s596_s30 }
  0x53   : > { %465 = vmatprep.subr.bf16.mxu0 %v893_v9  ;;  %s765_s18 = sshll.u32 %s593_s4, 7  ;;  %s1385_s28 = scalar_lea.sflag [#allocation4], %s234_s15 }
  0x54   : > { %s1371_s29 = scalar_lea.hbm %s1449_s3, %s765_s18  ;;  %s966_s27 = scalar_lea.vmem %s1366_s30, 512 }
  0x55   : > { %p967_p12 = scmp.ne.s32.totalorder %s1366_s30, %s966_s27  ;;  %p1458_p2 = scmp.ne.s32.totalorder %s1455_s7, 0 }
  0x56   : > { %466 = vmatpush1.bf16.msra.mxu0 %v895_v10  ;;  %s1095_s11 = smov [#allocation5]  }
  0x57   : > { %467 = vmatprep.subr.bf16.mxu0 %v896_v11  ;;  %p968_p4 = pnand %p967_p12, %p1458_p2  ;;  %s970_s23 = sshll.u32 %s1095_s11, 4  ;;  %s971_s23 = int_to_ptr.vmem [resolvable:$false] %s970_s23 }
  0x58   : > { %s972_s5 = scalar_lea.vmem %s971_s23, 1024  ;;  %p973_p1 = scmp.lt.s32.totalorder %s1366_s30, %s971_s23 }
  0x59   : > { %p969_p0 = pneg %p968_p4  ;;  %p974_p5 = scmp.lt.s32.totalorder %s972_s5, %s966_s27 }
  0x5a   : > { %468 = vmatpush1.bf16.msra.mxu0 %v898_v12 }
  0x5b   : > { %469 = vmatprep.subr.bf16.mxu0 %v899_v13  ;;  %p975_p8 = por %p974_p5, %p973_p1 }
  0x5d   : > { %p976_p3 = pnand %p975_p8, %p969_p0 }
  0x5e   : > { %470 = vmatpush1.bf16.msra.mxu0 %v901_v16 }
  0x5f   : > { %471 = vmatprep.subr.bf16.mxu0 %v902_v17 }
  0x62   : > { %472 = vmatpush1.bf16.msra.mxu0 %v904_v19 }
  0x63   : > { %473 = vmatprep.subr.bf16.mxu0 %v905_v20 }
  0x66   : > { %474 = vmatpush1.bf16.msra.mxu0 %v907_v21 }
  0x67   : > { %475 = vmatprep.subr.bf16.mxu0 %v908_v22 }
  0x6a   : > { %476 = vmatpush1.bf16.msra.mxu0 %v910_v23 }
  0x6b   : > { %477 = vmatprep.subr.bf16.mxu0 %v911_v24 }
  0x6e   : > { %478 = vmatpush1.bf16.msra.mxu0 %v913_v25 }
  0x6f   : > { %479 = vmatprep.subr.bf16.mxu0 %v914_v26 }
  0x72   : > { %480 = vmatpush1.bf16.msra.mxu0 %v916_v27 }
  0x73   : > { %481 = vmatprep.subr.bf16.mxu0 %v917_v28 }
  0x76   : > { %482 = vmatpush1.bf16.msra.mxu0 %v919_v29 }
  0x77   : > { %483 = vmatprep.subr.bf16.mxu0 %v920_v30 }
  0x7a   : > { %484 = vmatpush1.bf16.msra.mxu0 %v922_v31 }
  0x7b   : > { %485 = vmatprep.subr.bf16.mxu0 %v923_v32 }
  0x7e   : > { %486 = vmatpush1.bf16.msra.mxu0 %v925_v33 }
  0x7f   : > { %487 = vmatprep.subr.bf16.mxu0 %v926_v34 }
  0x82   : > { %488 = vmatpush1.bf16.msra.mxu0 %v928_v35 }
  0x85   : > { %490 = vmatmul.mubr.bf16.vlgmr.msra.gmra.mrb[0].mxu0 %v929_v36 }
  0xcd   : > { %v1314_v41 = vpop.permute.xlu0 %518 }
  0xce   : > { %vm523_vm0 = vcmp.eq.s32.totalorder %v1316_v42, %v1314_v41  ;;  %vm524_vm1 = vcmp.eq.s32.totalorder %v1318_v43, %v1314_v41 }
  0xd1   : > { %v1324_v45 = vpop.permute.xlu0 %521 }
  0xd2   : > { %vm525_vm2 = vcmp.eq.s32.totalorder %v1316_v42, %v1324_v45  ;;  %vm526_vm3 = vcmp.eq.s32.totalorder %v1318_v43, %v1324_v45 }
 0x158   : > { %v1322_v44 = vpop.f32.mrb[0].mxu0 }
 0x159   : > { %v756_v46 = vclamps-f32 %v1322_v44, 32.0  ;;  %v493_v47 = vpop.f32.mrb[1].mxu0 }
 0x15a   : > { %v757_v48 = vclamps-f32 %v493_v47, 32.0  ;;  %v1329_v49 = vpop.f32.mrb[2].mxu0 }
 0x15b   : > { %v758_v50 = vclamps-f32 %v1329_v49, 32.0  ;;  %v1334_v51 = vpop.f32.mrb[3].mxu0  ;;  %v527_v52 = vsel %vm523_vm0, %v756_v46, 0.0 }
 0x15c   : > { %v759_v53 = vclamps-f32 %v1334_v51, 32.0  ;;  %v528_v54 = vsel %vm524_vm1, %v757_v48, 0.0 }
 0x15d   : > { %v531_v55 = vadd.f32 %v528_v54, %v527_v52  ;;  %v529_v57 = vsel %vm525_vm2, %v758_v50, 0.0 }
 0x15e   : > { %v530_v56 = vsel %vm526_vm3, %v759_v53, 0.0 }
 0x15f   : > { %532 = vadd.xlane.f32.xlu1 %v531_v55  ;;  %v534_v58 = vadd.f32 %v530_v56, %v529_v57 }
 0x163   : > { %535 = vadd.xlane.f32.xlu1 %v534_v58 }
 0x1ec   : > { %v533_v59 = vpop.xlane.xlu1 %532 }
 0x1ed   : > { %v537_v60 = vmul.f32 0.03125, %v533_v59 }
 0x1ef   : > { %v539_v61 = vmul.f32 %v537_v60, %v537_v60  ;;  %v559_v11 = vmul.f32 0.9393727, %v537_v60  ;;  %vm565_vm7 = vcmp.gt.f32.partialorder %v537_v60, -0.9393727 }
 0x1f0   : > { %v536_v62 = vpop.xlane.xlu1 %535 }
 0x1f1   : > { %v541_v63 = vsub.f32 1.0, %v539_v61  ;;  %v538_v0 = vmul.f32 0.03125, %v536_v62 }
 0x1f3   : > { %v543_v1 = vmax.f32 %v541_v63, 0.0  ;;  %v540_v2 = vmul.f32 %v538_v0, %v538_v0  ;;  %v560_v20 = vmul.f32 0.9393727, %v538_v0  ;;  %vm566_vm9 = vcmp.gt.f32.partialorder %v538_v0, -0.9393727 }
 0x1f5   : > { %932 = vrsqrt.f32 %v543_v1  ;;  %v542_v3 = vsub.f32 1.0, %v540_v2  ;;  %vm547_vm4 = vcmp.eq.f32.partialorder %v543_v1, inf  ;;  %v550_v7 = vand.u32 2147483648, %v543_v1 }
 0x1f6   : > { %vm549_vm5 = vcmp.eq.f32.partialorder %v543_v1, 0.0 }
 0x1f7   : > { %v544_v4 = vmax.f32 %v542_v3, 0.0 }
 0x1f9   : > { %934 = vrsqrt.f32 %v544_v4  ;;  %vm554_vm6 = vcmp.eq.f32.partialorder %v544_v4, inf  ;;  %v557_v15 = vand.u32 2147483648, %v544_v4  ;;  %vm556_vm8 = vcmp.eq.f32.partialorder %v544_v4, 0.0 }
 0x1ff   : > { %v933_v5 = vpop.eup %932 }
 0x200   : > { %v546_v6 = vmul.f32 %v933_v5, %v543_v1 }
 0x202   : > { %v548_v8 = vsel %vm547_vm4, %v543_v1, %v546_v6 }
 0x203   : > { %v551_v9 = vsel %vm549_vm5, %v550_v7, %v548_v8  ;;  %v935_v10 = vpop.eup %934 }
 0x204   : > { %v561_v12 = vmul.f32 0.3428978, %v551_v9  ;;  %v553_v13 = vmul.f32 %v935_v10, %v544_v4 }
 0x206   : > { %v563_v14 = vsub.f32 %v559_v11, %v561_v12  ;;  %v555_v16 = vsel %vm554_vm6, %v544_v4, %v553_v13 }
 0x207   : > { %v558_v18 = vsel %vm556_vm8, %v557_v15, %v555_v16 }
 0x208   : > { %v567_v17 = vsel %vm565_vm7, %v563_v14, %v537_v60  ;;  %v562_v21 = vmul.f32 0.3428978, %v558_v18 }
 0x209   : > { %v569_v19 = vmul.f32 32.0, %v567_v17 }
 0x20a   : > { %v564_v24 = vsub.f32 %v560_v20, %v562_v21 }
 0x20b   : > { %v571_v22 = vsel %vm523_vm0, %v569_v19, %v756_v46  ;;  %v572_v23 = vsel %vm524_vm1, %v569_v19, %v757_v48 }
 0x20c   : > { %575 = vst [vmem:[%s236_s6] sm:$0xff] %v571_v22  ;;  %576 = vst [vmem:[%s236_s6 + $0x8] sm:$0xff] %v572_v23  ;;  %v568_v25 = vsel %vm566_vm9, %v564_v24, %v538_v0 }
 0x20d   : > { %v570_v26 = vmul.f32 32.0, %v568_v25 }
 0x20f   : > { %v573_v27 = vsel %vm525_vm2, %v570_v26, %v758_v50  ;;  %v574_v28 = vsel %vm526_vm3, %v570_v26, %v759_v53 }
 0x210   : > { %577 = vst [vmem:[%s236_s6 + $0x10] sm:$0xff] %v573_v27  ;;  %578 = vst [vmem:[%s236_s6 + $0x18] sm:$0xff] %v574_v28 }
 0x211   : > { %979 = shalt.err (!%p976_p3)
}
 0x212   : > { %s980_s15 = scalar_lea.hbm %s1371_s29, 512  ;;  %s984_s6 = scalar_lea.hbm %s1449_s3, 2048 }
 0x213   : > { %p981_p10 = scmp.ne.s32.totalorder %s1371_s29, %s980_s15  ;;  %p985_p9 = scmp.lt.u32.totalorder %s1371_s29, %s1449_s3 }
 0x214   : > { %p986_p13 = scmp.lt.u32.totalorder %s984_s6, %s980_s15  ;;  %p988_p12 = scmp.lt.u32.totalorder %s980_s15, %s1371_s29 }
 0x215   : > { %p982_p11 = pnand %p981_p10, %p1458_p2 }
 0x216   : > { %p987_p7 = por %p986_p13, %p985_p9 }
 0x217   : > { %p983_p6 = pneg %p982_p11 }
 0x218   : > { %p989_p4 = por %p988_p12, %p987_p7 }
 0x21a   : > { %p990_p0 = pnand %p989_p4, %p983_p6 }
 0x21c   : > { %993 = shalt.err (!%p990_p0)
}
 0x21d   : > { %s1096_s24 = smov 256   ;;  %s1097_s27 = smov 512  }
 0x21e   : > { %s1098_s11 = smov 16  }
 0x21f   : > { %773 = dma.vmem_to_hbm [thread:$0]  (%p1458_p2), %s1366_s30, 512, %s1371_s29, %s1385_s28, %s1096_s24, %s1097_s27, %s1098_s11  }
 0x220 PF: > { %p784_p1 = scmp.ge.s32.totalorder %s1088_s22, 2  ;;  %s611_s23 = sand.u32 1, %s1048_s12  }
 0x221   : > { %p1459_p5 = scmp.ne.s32.totalorder %s1456_s10, 0  ;;  %s612_s5 = scalar_lea.sflag [#allocation4], %s611_s23 }
 0x223   : > { %p780_p8 = pnand %p784_p1, %p1459_p5 }
 0x225   : > { %1043 = dma.done.wait (!%p780_p8), %s612_s5, 512  }
 0x226   : > { %1045 = vsyncadd (!%p780_p8), %s612_s5, 4294966784  ;;  %s19_s22 = sadd.s32 1, %s1088_s22   ;;  %s1460_s7 = sld [smem:[#allocation8_spill]] }
 0x227   : > { %p16_p3 = scmp.ge.s32.totalorder %s19_s22, 6   ;;  %s1461_s12 = smov %s1052_s13 }
 0x228   : > { %s1462_s13 = smov %s1056_s14  ;;  %s1463_s14 = smov %s1209_s9 }
 0x229   : > { %s1464_s15 = smov %s1064_s16  ;;  %s1465_s16 = smov %s1068_s17 }
 0x22a   : > { %s1466_s17 = smov %s1206_s8  ;;  %s1467_s18 = smov %s1080_s20 }
 0x22b   : > { %s1468_s19 = smov %s1084_s21  ;;  %s1469_s20 = smov %s1472_s25 }
 0x22c   : > { %s1470_s21 = smov %s1460_s7  ;;  %18 = sbr.rel (!%p16_p3) target bundleno = 9 (0x9), region = 83 }
 0x233   :  { %617 = vsyncpa [#allocation3], 1 }
 0x234   :  { %619 = vsyncpa [#allocation3 + $0x1], 1 }
 0x235   :  { %620 = vsyncpa [#allocation4], 1 }
 0x236   :  { %622 = vsyncpa [#allocation4 + $0x1], 1 }

</bundles_post_ra>
